<compile_context>
chip_gen: v6e
topology: v6e:2x2x1
jax: 0.10.0
libtpu: 0.0.40
codegen_flags: <defaults>
</compile_context>

<pallas_src>
import functools

import jax
import jax.numpy as jnp
from jax.experimental import pallas as pl
from jax.experimental.pallas import tpu as pltpu


def unet_down_kernel(p_ref, w1_ref, b1_ref, w2_ref, b2_ref, col_ref, o_ref,
                     sb1_ref, sb2_ref, hp_ref, *, Hp, Wp):
    """Fused conv3x3+ReLU -> in-VMEM reflection pad -> conv3x3+ReLU.

    Layout: activations are (C, L) with L = (Hp+2)*(Wp+2) flattened padded
    spatial positions on the lane axis.  The conv output for output pixel
    (y, x) sits at flat position f = y*(Wp+2) + x.

    p_ref  : (1, Cin, Lx)   reflection-padded pooled input (flat) + zero tail
    w1_ref : (Cout, 9*Cin)  tap-major (dy, dx, ci) conv1 weights
    b1_ref : (Cout, 1)
    w2_ref : (Cout, 9*Cout)
    b2_ref : (Cout, 1)
    col_ref: (1, L) int32   precomputed f % (Wp+2)
    o_ref  : (1, Cout, L)   conv2 output over the padded flat grid
    sb1_ref: (9*Cin, L)     VMEM im2col staging (K axis on sublanes)
    sb2_ref: (9*Cout, L)    VMEM im2col staging for conv2
    hp_ref : (Cout, L + 2*(Wp+2) + 4) reflection-padded conv1 output
             (2 guard lanes in front, tap-shift headroom behind)
    """
    Cin = p_ref.shape[1]
    Cout = o_ref.shape[1]
    Wpad = Wp + 2
    L = (Hp + 2) * Wpad
    G = 2                                  # front guard lanes in hp_ref
    taps = [(dy, dx) for dy in range(3) for dx in range(3)]

    # ---------------- conv1: single K = 9*Cin MXU contraction ----------------
    for t, (dy, dx) in enumerate(taps):
        d = dy * Wpad + dx                 # flat shift of this tap
        sb1_ref[t * Cin:(t + 1) * Cin, :] = p_ref[0, :, d:d + L]
    h1 = jnp.dot(w1_ref[...], sb1_ref[...],
                 preferred_element_type=jnp.float32)             # (Cout, L)
    h1 = jnp.maximum(h1 + b1_ref[...], 0.0)

    # ------------- ReflectionPad2d(1) of h1, kept in a VMEM scratch ----------
    hp_ref[...] = jnp.zeros(hp_ref.shape, hp_ref.dtype)
    # interior: padded position g = y'*Wpad + x'  <-  h1[g - Wpad - 1]
    hp_ref[:, G + Wpad + 1:G + Wpad + 1 + L] = h1
    # top / bottom padded rows mirror padded rows 2 / Hp-1
    hp_ref[:, G:G + Wpad] = hp_ref[:, G + 2 * Wpad:G + 3 * Wpad]
    hp_ref[:, G + (Hp + 1) * Wpad:G + (Hp + 2) * Wpad] = (
        hp_ref[:, G + (Hp - 1) * Wpad:G + Hp * Wpad])
    # left / right padded columns mirror padded columns 2 / Wp-1
    xcol = col_ref[...]                                          # (1, L)
    h_mid = hp_ref[:, G:G + L]
    h_plus2 = hp_ref[:, G + 2:G + 2 + L]
    h_minus2 = hp_ref[:, G - 2:G - 2 + L]
    h_fix = jnp.where(xcol == 0, h_plus2, h_mid)
    h_fix = jnp.where(xcol == Wp + 1, h_minus2, h_fix)
    hp_ref[:, G:G + L] = h_fix

    # ---------------- conv2: single K = 9*Cout MXU contraction ---------------
    for t, (dy, dx) in enumerate(taps):
        d = dy * Wpad + dx
        sb2_ref[t * Cout:(t + 1) * Cout, :] = hp_ref[:, G + d:G + d + L]
    h2 = jnp.dot(w2_ref[...], sb2_ref[...],
                 preferred_element_type=jnp.float32)             # (Cout, L)
    h2 = jnp.maximum(h2 + b2_ref[...], 0.0)
    o_ref[0] = h2


def unet_down_forward(x_nchw, params):
    """unetDown.forward: MaxPool2d(2,2) -> [reflect-pad conv3x3 + ReLU] x 2."""
    N, Cin, H, W = x_nchw.shape
    assert H % 2 == 0 and W % 2 == 0, (H, W)
    Hp, Wp = H // 2, W // 2
    Wpad = Wp + 2
    L = (Hp + 2) * Wpad                    # flat padded spatial length
    Lx = L + 2 * Wpad + 2                  # + shift headroom for the 9 taps
    w1, b1, w2, b2 = params["w1"], params["b1"], params["w2"], params["b2"]
    Cout = w1.shape[0]

    x = x_nchw.astype(jnp.float32)
    # MaxPool2d(2,2) + ReflectionPad2d(1) of the input: cheap XLA glue on the
    # 4x-smaller pooled tensor; everything downstream is fused in the kernel.
    pooled = x.reshape(N, Cin, Hp, 2, Wp, 2).max(axis=(3, 5))
    padded = jnp.pad(pooled, ((0, 0), (0, 0), (1, 1), (1, 1)), mode="reflect")
    p_flat = padded.reshape(N, Cin, L)
    p_flat = jnp.pad(p_flat, ((0, 0), (0, 0), (0, Lx - L)))       # zero tail

    # PyTorch OIHW -> (Cout, 9*C) with tap-major (dy, dx, ci) column order.
    w1f = jnp.transpose(w1, (0, 2, 3, 1)).reshape(Cout, 9 * Cin).astype(jnp.float32)
    w2f = jnp.transpose(w2, (0, 2, 3, 1)).reshape(Cout, 9 * Cout).astype(jnp.float32)
    b1c = b1.reshape(Cout, 1).astype(jnp.float32)
    b2c = b2.reshape(Cout, 1).astype(jnp.float32)
    colmap = (jnp.arange(L, dtype=jnp.int32) % Wpad).reshape(1, L)

    kernel = functools.partial(unet_down_kernel, Hp=Hp, Wp=Wp)
    out_flat = pl.pallas_call(
        kernel,
        out_shape=jax.ShapeDtypeStruct((N, Cout, L), jnp.float32),
        grid=(N,),
        in_specs=[
            pl.BlockSpec((1, Cin, Lx), lambda n: (n, 0, 0)),
            pl.BlockSpec((Cout, 9 * Cin), lambda n: (0, 0)),
            pl.BlockSpec((Cout, 1), lambda n: (0, 0)),
            pl.BlockSpec((Cout, 9 * Cout), lambda n: (0, 0)),
            pl.BlockSpec((Cout, 1), lambda n: (0, 0)),
            pl.BlockSpec((1, L), lambda n: (0, 0)),
        ],
        out_specs=pl.BlockSpec((1, Cout, L), lambda n: (n, 0, 0)),
        scratch_shapes=[
            pltpu.VMEM((9 * Cin, L), jnp.float32),
            pltpu.VMEM((9 * Cout, L), jnp.float32),
            pltpu.VMEM((Cout, Lx + 2), jnp.float32),
        ],
        compiler_params=pltpu.CompilerParams(
            dimension_semantics=("parallel",)),
    )(p_flat, w1f, b1c, w2f, b2c, colmap)

    # Valid conv outputs live at flat position y*(Wp+2)+x; crop the pad ring.
    out = out_flat.reshape(N, Cout, Hp + 2, Wpad)[:, :, :Hp, :Wp]
    return out


def init_unet_down_params(key, in_size, out_size):
    """Deterministic synthetic parameters in PyTorch layout (OIHW weights)."""
    k = jax.random.split(key, 4)
    s = 0.1
    return {
        "w1": (s * jax.random.normal(k[0], (out_size, in_size, 3, 3))).astype(jnp.float32),
        "b1": (s * jax.random.normal(k[1], (out_size,))).astype(jnp.float32),
        "w2": (s * jax.random.normal(k[2], (out_size, out_size, 3, 3))).astype(jnp.float32),
        "b2": (s * jax.random.normal(k[3], (out_size,))).astype(jnp.float32),
    }


if __name__ == "__main__":
    key = jax.random.PRNGKey(0)
    k_x, k_p = jax.random.split(key)

    batch, in_size, out_size = 2, 8, 16
    H = W = 32                               # pooled 16x16 -> output 16x16

    x = jax.random.normal(k_x, (batch, in_size, H, W), dtype=jnp.float32)
    params = init_unet_down_params(k_p, in_size, out_size)

    fwd = jax.jit(unet_down_forward)
    out = fwd(x, params)
    out = jax.block_until_ready(out)

    assert out.shape == (batch, out_size, H // 2, W // 2), out.shape
    print("KERNEL_OK")
</pallas_src>

<mosaic_0001>
module attributes {stable_mosaic.version = 11 : i64} {
  func.func @unet_down_kernel(%arg0: i32, %arg1: memref<1x8x362xf32, #tpu.memory_space<vmem>>, %arg2: memref<16x72xf32, #tpu.memory_space<vmem>>, %arg3: memref<16x1xf32, #tpu.memory_space<vmem>>, %arg4: memref<16x144xf32, #tpu.memory_space<vmem>>, %arg5: memref<16x1xf32, #tpu.memory_space<vmem>>, %arg6: memref<1x324xi32, #tpu.memory_space<vmem>>, %arg7: memref<1x16x324xf32, #tpu.memory_space<vmem>>, %arg8: memref<72x324xf32, #tpu.memory_space<vmem>>, %arg9: memref<144x324xf32, #tpu.memory_space<vmem>>, %arg10: memref<16x364xf32, #tpu.memory_space<vmem>>) attributes {dimension_semantics = [#tpu.dimension_semantics<parallel>], iteration_bounds = array<i64: 2>, scalar_prefetch = 0 : i64, scratch_operands = 3 : i64, tpu.core_type = #tpu.core_type<tc>, window_params = [{transform_indices = @transform_0, window_bounds = array<i64: 1, 8, 362>}, {pipeline_mode = #tpu.pipeline_mode<synchronous>, transform_indices = @transform_1, window_bounds = array<i64: 16, 72>}, {pipeline_mode = #tpu.pipeline_mode<synchronous>, transform_indices = @transform_2, window_bounds = array<i64: 16, 1>}, {pipeline_mode = #tpu.pipeline_mode<synchronous>, transform_indices = @transform_3, window_bounds = array<i64: 16, 144>}, {pipeline_mode = #tpu.pipeline_mode<synchronous>, transform_indices = @transform_4, window_bounds = array<i64: 16, 1>}, {pipeline_mode = #tpu.pipeline_mode<synchronous>, transform_indices = @transform_5, window_bounds = array<i64: 1, 324>}, {transform_indices = @transform_6, window_bounds = array<i64: 1, 16, 324>}]} {
    %c0 = arith.constant 0 : index
    %c0_0 = arith.constant 0 : index
    %c0_1 = arith.constant 0 : index
    %0 = vector.load %arg1[%c0, %c0_0, %c0_1] : memref<1x8x362xf32, #tpu.memory_space<vmem>>, vector<1x8x324xf32>
    %1 = vector.shape_cast %0 : vector<1x8x324xf32> to vector<8x324xf32>
    %c0_2 = arith.constant 0 : index
    %c0_3 = arith.constant 0 : index
    %2 = vector.load %arg8[%c0_2, %c0_3] : memref<72x324xf32, #tpu.memory_space<vmem>>, vector<8x324xf32>
    tpu.vector_store %arg8[%c0_2, %c0_3], %1 {strides = array<i32>} : memref<72x324xf32, #tpu.memory_space<vmem>>, vector<8x324xf32>,
    %c0_4 = arith.constant 0 : index
    %c0_5 = arith.constant 0 : index
    %c1 = arith.constant 1 : index
    %3 = vector.load %arg1[%c0_4, %c0_5, %c1] : memref<1x8x362xf32, #tpu.memory_space<vmem>>, vector<1x8x324xf32>
    %4 = vector.shape_cast %3 : vector<1x8x324xf32> to vector<8x324xf32>
    %c8 = arith.constant 8 : index
    %c0_6 = arith.constant 0 : index
    %5 = vector.load %arg8[%c8, %c0_6] : memref<72x324xf32, #tpu.memory_space<vmem>>, vector<8x324xf32>
    tpu.vector_store %arg8[%c8, %c0_6], %4 {strides = array<i32>} : memref<72x324xf32, #tpu.memory_space<vmem>>, vector<8x324xf32>,
    %c0_7 = arith.constant 0 : index
    %c0_8 = arith.constant 0 : index
    %c2 = arith.constant 2 : index
    %6 = vector.load %arg1[%c0_7, %c0_8, %c2] : memref<1x8x362xf32, #tpu.memory_space<vmem>>, vector<1x8x324xf32>
    %7 = vector.shape_cast %6 : vector<1x8x324xf32> to vector<8x324xf32>
    %c16 = arith.constant 16 : index
    %c0_9 = arith.constant 0 : index
    %8 = vector.load %arg8[%c16, %c0_9] : memref<72x324xf32, #tpu.memory_space<vmem>>, vector<8x324xf32>
    tpu.vector_store %arg8[%c16, %c0_9], %7 {strides = array<i32>} : memref<72x324xf32, #tpu.memory_space<vmem>>, vector<8x324xf32>,
    %c0_10 = arith.constant 0 : index
    %c0_11 = arith.constant 0 : index
    %c18 = arith.constant 18 : index
    %9 = vector.load %arg1[%c0_10, %c0_11, %c18] : memref<1x8x362xf32, #tpu.memory_space<vmem>>, vector<1x8x324xf32>
    %10 = vector.shape_cast %9 : vector<1x8x324xf32> to vector<8x324xf32>
    %c24 = arith.constant 24 : index
    %c0_12 = arith.constant 0 : index
    %11 = vector.load %arg8[%c24, %c0_12] : memref<72x324xf32, #tpu.memory_space<vmem>>, vector<8x324xf32>
    tpu.vector_store %arg8[%c24, %c0_12], %10 {strides = array<i32>} : memref<72x324xf32, #tpu.memory_space<vmem>>, vector<8x324xf32>,
    %c0_13 = arith.constant 0 : index
    %c0_14 = arith.constant 0 : index
    %c19 = arith.constant 19 : index
    %12 = vector.load %arg1[%c0_13, %c0_14, %c19] : memref<1x8x362xf32, #tpu.memory_space<vmem>>, vector<1x8x324xf32>
    %13 = vector.shape_cast %12 : vector<1x8x324xf32> to vector<8x324xf32>
    %c32 = arith.constant 32 : index
    %c0_15 = arith.constant 0 : index
    %14 = vector.load %arg8[%c32, %c0_15] : memref<72x324xf32, #tpu.memory_space<vmem>>, vector<8x324xf32>
    tpu.vector_store %arg8[%c32, %c0_15], %13 {strides = array<i32>} : memref<72x324xf32, #tpu.memory_space<vmem>>, vector<8x324xf32>,
    %c0_16 = arith.constant 0 : index
    %c0_17 = arith.constant 0 : index
    %c20 = arith.constant 20 : index
    %15 = vector.load %arg1[%c0_16, %c0_17, %c20] : memref<1x8x362xf32, #tpu.memory_space<vmem>>, vector<1x8x324xf32>
    %16 = vector.shape_cast %15 : vector<1x8x324xf32> to vector<8x324xf32>
    %c40 = arith.constant 40 : index
    %c0_18 = arith.constant 0 : index
    %17 = vector.load %arg8[%c40, %c0_18] : memref<72x324xf32, #tpu.memory_space<vmem>>, vector<8x324xf32>
    tpu.vector_store %arg8[%c40, %c0_18], %16 {strides = array<i32>} : memref<72x324xf32, #tpu.memory_space<vmem>>, vector<8x324xf32>,
    %c0_19 = arith.constant 0 : index
    %c0_20 = arith.constant 0 : index
    %c36 = arith.constant 36 : index
    %18 = vector.load %arg1[%c0_19, %c0_20, %c36] : memref<1x8x362xf32, #tpu.memory_space<vmem>>, vector<1x8x324xf32>
    %19 = vector.shape_cast %18 : vector<1x8x324xf32> to vector<8x324xf32>
    %c48 = arith.constant 48 : index
    %c0_21 = arith.constant 0 : index
    %20 = vector.load %arg8[%c48, %c0_21] : memref<72x324xf32, #tpu.memory_space<vmem>>, vector<8x324xf32>
    tpu.vector_store %arg8[%c48, %c0_21], %19 {strides = array<i32>} : memref<72x324xf32, #tpu.memory_space<vmem>>, vector<8x324xf32>,
    %c0_22 = arith.constant 0 : index
    %c0_23 = arith.constant 0 : index
    %c37 = arith.constant 37 : index
    %21 = vector.load %arg1[%c0_22, %c0_23, %c37] : memref<1x8x362xf32, #tpu.memory_space<vmem>>, vector<1x8x324xf32>
    %22 = vector.shape_cast %21 : vector<1x8x324xf32> to vector<8x324xf32>
    %c56 = arith.constant 56 : index
    %c0_24 = arith.constant 0 : index
    %23 = vector.load %arg8[%c56, %c0_24] : memref<72x324xf32, #tpu.memory_space<vmem>>, vector<8x324xf32>
    tpu.vector_store %arg8[%c56, %c0_24], %22 {strides = array<i32>} : memref<72x324xf32, #tpu.memory_space<vmem>>, vector<8x324xf32>,
    %c0_25 = arith.constant 0 : index
    %c0_26 = arith.constant 0 : index
    %c38 = arith.constant 38 : index
    %24 = vector.load %arg1[%c0_25, %c0_26, %c38] : memref<1x8x362xf32, #tpu.memory_space<vmem>>, vector<1x8x324xf32>
    %25 = vector.shape_cast %24 : vector<1x8x324xf32> to vector<8x324xf32>
    %c64 = arith.constant 64 : index
    %c0_27 = arith.constant 0 : index
    %26 = vector.load %arg8[%c64, %c0_27] : memref<72x324xf32, #tpu.memory_space<vmem>>, vector<8x324xf32>
    tpu.vector_store %arg8[%c64, %c0_27], %25 {strides = array<i32>} : memref<72x324xf32, #tpu.memory_space<vmem>>, vector<8x324xf32>,
    %c0_28 = arith.constant 0 : index
    %c0_29 = arith.constant 0 : index
    %27 = vector.load %arg2[%c0_28, %c0_29] : memref<16x72xf32, #tpu.memory_space<vmem>>, vector<16x72xf32>
    %c0_30 = arith.constant 0 : index
    %c0_31 = arith.constant 0 : index
    %28 = vector.load %arg8[%c0_30, %c0_31] : memref<72x324xf32, #tpu.memory_space<vmem>>, vector<72x324xf32>
    %cst = arith.constant dense<0.000000e+00> : vector<16x324xf32>
    %29 = tpu.matmul %27, %28, %cst {dimension_numbers = #tpu.dot_dimension_numbers<[1], [0], [0], [1], [0, 0, 1, 1], [], []>} : vector<16x72xf32>, vector<72x324xf32>, vector<16x324xf32> -> vector<16x324xf32>
    %c0_32 = arith.constant 0 : index
    %c0_33 = arith.constant 0 : index
    %30 = vector.load %arg3[%c0_32, %c0_33] : memref<16x1xf32, #tpu.memory_space<vmem>>, vector<16x1xf32>
    %31 = vector.broadcast %30 : vector<16x1xf32> to vector<16x324xf32>
    %32 = arith.addf %29, %31 : vector<16x324xf32>
    %cst_34 = arith.constant 0.000000e+00 : f32
    %33 = vector.broadcast %cst_34 : f32 to vector<16x324xf32>
    %34 = arith.maximumf %32, %33 : vector<16x324xf32>
    %cst_35 = arith.constant 0.000000e+00 : f32
    %35 = vector.broadcast %cst_35 : f32 to vector<16x364xf32>
    %c0_36 = arith.constant 0 : index
    %c0_37 = arith.constant 0 : index
    %36 = vector.load %arg10[%c0_36, %c0_37] : memref<16x364xf32, #tpu.memory_space<vmem>>, vector<16x364xf32>
    tpu.vector_store %arg10[%c0_36, %c0_37], %35 {strides = array<i32>} : memref<16x364xf32, #tpu.memory_space<vmem>>, vector<16x364xf32>,
    %c0_38 = arith.constant 0 : index
    %c21 = arith.constant 21 : index
    %37 = vector.load %arg10[%c0_38, %c21] : memref<16x364xf32, #tpu.memory_space<vmem>>, vector<16x324xf32>
    tpu.vector_store %arg10[%c0_38, %c21], %34 {strides = array<i32>} : memref<16x364xf32, #tpu.memory_space<vmem>>, vector<16x324xf32>,
    %c0_39 = arith.constant 0 : index
    %c38_40 = arith.constant 38 : index
    %38 = vector.load %arg10[%c0_39, %c38_40] : memref<16x364xf32, #tpu.memory_space<vmem>>, vector<16x18xf32>
    %c0_41 = arith.constant 0 : index
    %c2_42 = arith.constant 2 : index
    %39 = vector.load %arg10[%c0_41, %c2_42] : memref<16x364xf32, #tpu.memory_space<vmem>>, vector<16x18xf32>
    tpu.vector_store %arg10[%c0_41, %c2_42], %38 {strides = array<i32>} : memref<16x364xf32, #tpu.memory_space<vmem>>, vector<16x18xf32>,
    %c0_43 = arith.constant 0 : index
    %c272 = arith.constant 272 : index
    %40 = vector.load %arg10[%c0_43, %c272] : memref<16x364xf32, #tpu.memory_space<vmem>>, vector<16x18xf32>
    %c0_44 = arith.constant 0 : index
    %c308 = arith.constant 308 : index
    %41 = vector.load %arg10[%c0_44, %c308] : memref<16x364xf32, #tpu.memory_space<vmem>>, vector<16x18xf32>
    tpu.vector_store %arg10[%c0_44, %c308], %40 {strides = array<i32>} : memref<16x364xf32, #tpu.memory_space<vmem>>, vector<16x18xf32>,
    %c0_45 = arith.constant 0 : index
    %c0_46 = arith.constant 0 : index
    %42 = vector.load %arg6[%c0_45, %c0_46] : memref<1x324xi32, #tpu.memory_space<vmem>>, vector<1x324xi32>
    %c0_47 = arith.constant 0 : index
    %c2_48 = arith.constant 2 : index
    %43 = vector.load %arg10[%c0_47, %c2_48] : memref<16x364xf32, #tpu.memory_space<vmem>>, vector<16x324xf32>
    %c0_49 = arith.constant 0 : index
    %c4 = arith.constant 4 : index
    %44 = vector.load %arg10[%c0_49, %c4] : memref<16x364xf32, #tpu.memory_space<vmem>>, vector<16x324xf32>
    %c0_50 = arith.constant 0 : index
    %c0_51 = arith.constant 0 : index
    %45 = vector.load %arg10[%c0_50, %c0_51] : memref<16x364xf32, #tpu.memory_space<vmem>>, vector<16x324xf32>
    %c0_i32 = arith.constant 0 : i32
    %46 = vector.broadcast %c0_i32 : i32 to vector<1x324xi32>
    %47 = arith.cmpi eq, %42, %46 : vector<1x324xi32>
    %48 = vector.shape_cast %47 : vector<1x324xi1> to vector<1x324xi1>
    %49 = vector.broadcast %48 : vector<1x324xi1> to vector<16x324xi1>
    %50 = arith.select %49, %44, %43 : vector<16x324xi1>, vector<16x324xf32>
    %c17_i32 = arith.constant 17 : i32
    %51 = vector.broadcast %c17_i32 : i32 to vector<1x324xi32>
    %52 = arith.cmpi eq, %42, %51 : vector<1x324xi32>
    %53 = vector.shape_cast %52 : vector<1x324xi1> to vector<1x324xi1>
    %54 = vector.broadcast %53 : vector<1x324xi1> to vector<16x324xi1>
    %55 = arith.select %54, %45, %50 : vector<16x324xi1>, vector<16x324xf32>
    %c0_52 = arith.constant 0 : index
    %c2_53 = arith.constant 2 : index
    %56 = vector.load %arg10[%c0_52, %c2_53] : memref<16x364xf32, #tpu.memory_space<vmem>>, vector<16x324xf32>
    tpu.vector_store %arg10[%c0_52, %c2_53], %55 {strides = array<i32>} : memref<16x364xf32, #tpu.memory_space<vmem>>, vector<16x324xf32>,
    %c0_54 = arith.constant 0 : index
    %c2_55 = arith.constant 2 : index
    %57 = vector.load %arg10[%c0_54, %c2_55] : memref<16x364xf32, #tpu.memory_space<vmem>>, vector<16x324xf32>
    %c0_56 = arith.constant 0 : index
    %c0_57 = arith.constant 0 : index
    %58 = vector.load %arg9[%c0_56, %c0_57] : memref<144x324xf32, #tpu.memory_space<vmem>>, vector<16x324xf32>
    tpu.vector_store %arg9[%c0_56, %c0_57], %57 {strides = array<i32>} : memref<144x324xf32, #tpu.memory_space<vmem>>, vector<16x324xf32>,
    %c0_58 = arith.constant 0 : index
    %c3 = arith.constant 3 : index
    %59 = vector.load %arg10[%c0_58, %c3] : memref<16x364xf32, #tpu.memory_space<vmem>>, vector<16x324xf32>
    %c16_59 = arith.constant 16 : index
    %c0_60 = arith.constant 0 : index
    %60 = vector.load %arg9[%c16_59, %c0_60] : memref<144x324xf32, #tpu.memory_space<vmem>>, vector<16x324xf32>
    tpu.vector_store %arg9[%c16_59, %c0_60], %59 {strides = array<i32>} : memref<144x324xf32, #tpu.memory_space<vmem>>, vector<16x324xf32>,
    %c0_61 = arith.constant 0 : index
    %c4_62 = arith.constant 4 : index
    %61 = vector.load %arg10[%c0_61, %c4_62] : memref<16x364xf32, #tpu.memory_space<vmem>>, vector<16x324xf32>
    %c32_63 = arith.constant 32 : index
    %c0_64 = arith.constant 0 : index
    %62 = vector.load %arg9[%c32_63, %c0_64] : memref<144x324xf32, #tpu.memory_space<vmem>>, vector<16x324xf32>
    tpu.vector_store %arg9[%c32_63, %c0_64], %61 {strides = array<i32>} : memref<144x324xf32, #tpu.memory_space<vmem>>, vector<16x324xf32>,
    %c0_65 = arith.constant 0 : index
    %c20_66 = arith.constant 20 : index
    %63 = vector.load %arg10[%c0_65, %c20_66] : memref<16x364xf32, #tpu.memory_space<vmem>>, vector<16x324xf32>
    %c48_67 = arith.constant 48 : index
    %c0_68 = arith.constant 0 : index
    %64 = vector.load %arg9[%c48_67, %c0_68] : memref<144x324xf32, #tpu.memory_space<vmem>>, vector<16x324xf32>
    tpu.vector_store %arg9[%c48_67, %c0_68], %63 {strides = array<i32>} : memref<144x324xf32, #tpu.memory_space<vmem>>, vector<16x324xf32>,
    %c0_69 = arith.constant 0 : index
    %c21_70 = arith.constant 21 : index
    %65 = vector.load %arg10[%c0_69, %c21_70] : memref<16x364xf32, #tpu.memory_space<vmem>>, vector<16x324xf32>
    %c64_71 = arith.constant 64 : index
    %c0_72 = arith.constant 0 : index
    %66 = vector.load %arg9[%c64_71, %c0_72] : memref<144x324xf32, #tpu.memory_space<vmem>>, vector<16x324xf32>
    tpu.vector_store %arg9[%c64_71, %c0_72], %65 {strides = array<i32>} : memref<144x324xf32, #tpu.memory_space<vmem>>, vector<16x324xf32>,
    %c0_73 = arith.constant 0 : index
    %c22 = arith.constant 22 : index
    %67 = vector.load %arg10[%c0_73, %c22] : memref<16x364xf32, #tpu.memory_space<vmem>>, vector<16x324xf32>
    %c80 = arith.constant 80 : index
    %c0_74 = arith.constant 0 : index
    %68 = vector.load %arg9[%c80, %c0_74] : memref<144x324xf32, #tpu.memory_space<vmem>>, vector<16x324xf32>
    tpu.vector_store %arg9[%c80, %c0_74], %67 {strides = array<i32>} : memref<144x324xf32, #tpu.memory_space<vmem>>, vector<16x324xf32>,
    %c0_75 = arith.constant 0 : index
    %c38_76 = arith.constant 38 : index
    %69 = vector.load %arg10[%c0_75, %c38_76] : memref<16x364xf32, #tpu.memory_space<vmem>>, vector<16x324xf32>
    %c96 = arith.constant 96 : index
    %c0_77 = arith.constant 0 : index
    %70 = vector.load %arg9[%c96, %c0_77] : memref<144x324xf32, #tpu.memory_space<vmem>>, vector<16x324xf32>
    tpu.vector_store %arg9[%c96, %c0_77], %69 {strides = array<i32>} : memref<144x324xf32, #tpu.memory_space<vmem>>, vector<16x324xf32>,
    %c0_78 = arith.constant 0 : index
    %c39 = arith.constant 39 : index
    %71 = vector.load %arg10[%c0_78, %c39] : memref<16x364xf32, #tpu.memory_space<vmem>>, vector<16x324xf32>
    %c112 = arith.constant 112 : index
    %c0_79 = arith.constant 0 : index
    %72 = vector.load %arg9[%c112, %c0_79] : memref<144x324xf32, #tpu.memory_space<vmem>>, vector<16x324xf32>
    tpu.vector_store %arg9[%c112, %c0_79], %71 {strides = array<i32>} : memref<144x324xf32, #tpu.memory_space<vmem>>, vector<16x324xf32>,
    %c0_80 = arith.constant 0 : index
    %c40_81 = arith.constant 40 : index
    %73 = vector.load %arg10[%c0_80, %c40_81] : memref<16x364xf32, #tpu.memory_space<vmem>>, vector<16x324xf32>
    %c128 = arith.constant 128 : index
    %c0_82 = arith.constant 0 : index
    %74 = vector.load %arg9[%c128, %c0_82] : memref<144x324xf32, #tpu.memory_space<vmem>>, vector<16x324xf32>
    tpu.vector_store %arg9[%c128, %c0_82], %73 {strides = array<i32>} : memref<144x324xf32, #tpu.memory_space<vmem>>, vector<16x324xf32>,
    %c0_83 = arith.constant 0 : index
    %c0_84 = arith.constant 0 : index
    %75 = vector.load %arg4[%c0_83, %c0_84] : memref<16x144xf32, #tpu.memory_space<vmem>>, vector<16x144xf32>
    %c0_85 = arith.constant 0 : index
    %c0_86 = arith.constant 0 : index
    %76 = vector.load %arg9[%c0_85, %c0_86] : memref<144x324xf32, #tpu.memory_space<vmem>>, vector<144x324xf32>
    %cst_87 = arith.constant dense<0.000000e+00> : vector<16x324xf32>
    %77 = tpu.matmul %75, %76, %cst_87 {dimension_numbers = #tpu.dot_dimension_numbers<[1], [0], [0], [1], [0, 0, 1, 1], [], []>} : vector<16x144xf32>, vector<144x324xf32>, vector<16x324xf32> -> vector<16x324xf32>
    %c0_88 = arith.constant 0 : index
    %c0_89 = arith.constant 0 : index
    %78 = vector.load %arg5[%c0_88, %c0_89] : memref<16x1xf32, #tpu.memory_space<vmem>>, vector<16x1xf32>
    %79 = vector.broadcast %78 : vector<16x1xf32> to vector<16x324xf32>
    %80 = arith.addf %77, %79 : vector<16x324xf32>
    %cst_90 = arith.constant 0.000000e+00 : f32
    %81 = vector.broadcast %cst_90 : f32 to vector<16x324xf32>
    %82 = arith.maximumf %80, %81 : vector<16x324xf32>
    %c0_91 = arith.constant 0 : index
    %c0_92 = arith.constant 0 : index
    %c0_93 = arith.constant 0 : index
    %83 = vector.load %arg7[%c0_91, %c0_92, %c0_93] : memref<1x16x324xf32, #tpu.memory_space<vmem>>, vector<1x16x324xf32>
    %84 = vector.shape_cast %83 : vector<1x16x324xf32> to vector<16x324xf32>
    %85 = vector.shape_cast %82 : vector<16x324xf32> to vector<1x16x324xf32>
    tpu.vector_store %arg7[%c0_91, %c0_92, %c0_93], %85 {strides = array<i32>} : memref<1x16x324xf32, #tpu.memory_space<vmem>>, vector<1x16x324xf32>,
    return
  }
  func.func @transform_0(%arg0: i32) -> (i32, i32, i32) {
    %c0_i32 = arith.constant 0 : i32
    %c0_i32_0 = arith.constant 0 : i32
    %c0_i32_1 = arith.constant 0 : i32
    return %arg0, %c0_i32, %c0_i32_0 : i32, i32, i32
  }
  func.func @transform_1(%arg0: i32) -> (i32, i32) {
    %c0_i32 = arith.constant 0 : i32
    %c0_i32_0 = arith.constant 0 : i32
    %c0_i32_1 = arith.constant 0 : i32
    return %c0_i32, %c0_i32_0 : i32, i32
  }
  func.func @transform_2(%arg0: i32) -> (i32, i32) {
    %c0_i32 = arith.constant 0 : i32
    %c0_i32_0 = arith.constant 0 : i32
    %c0_i32_1 = arith.constant 0 : i32
    return %c0_i32, %c0_i32_0 : i32, i32
  }
  func.func @transform_3(%arg0: i32) -> (i32, i32) {
    %c0_i32 = arith.constant 0 : i32
    %c0_i32_0 = arith.constant 0 : i32
    %c0_i32_1 = arith.constant 0 : i32
    return %c0_i32, %c0_i32_0 : i32, i32
  }
  func.func @transform_4(%arg0: i32) -> (i32, i32) {
    %c0_i32 = arith.constant 0 : i32
    %c0_i32_0 = arith.constant 0 : i32
    %c0_i32_1 = arith.constant 0 : i32
    return %c0_i32, %c0_i32_0 : i32, i32
  }
  func.func @transform_5(%arg0: i32) -> (i32, i32) {
    %c0_i32 = arith.constant 0 : i32
    %c0_i32_0 = arith.constant 0 : i32
    %c0_i32_1 = arith.constant 0 : i32
    return %c0_i32, %c0_i32_0 : i32, i32
  }
  func.func @transform_6(%arg0: i32) -> (i32, i32, i32) {
    %c0_i32 = arith.constant 0 : i32
    %c0_i32_0 = arith.constant 0 : i32
    %c0_i32_1 = arith.constant 0 : i32
    return %arg0, %c0_i32, %c0_i32_0 : i32, i32, i32
  }
}

</mosaic_0001>

<bundles_post_ra>
// kernel: unet_down_forward.1
= control target key start
LH: loop header
LB: loop body
LE: loop exit
PB: predicated region body
PF: predicated region fallthrough
CT: control target
= control target key end

     0   :  { %s1645_s21 = smov 0   ;;  %s2048_s0 = inlined_call_operand.vmem [shape: f32[2,8,362], index: 0, kind: input, shape index: {}]   ;;  %s2049_s1 = inlined_call_operand.vmem [shape: f32[16,72], index: 1, kind: input, shape index: {}]   ;;  %s2050_s2 = inlined_call_operand.vmem [shape: f32[16,1], index: 2, kind: input, shape index: {}]   ;;  %s2051_s3 = inlined_call_operand.vmem [shape: f32[16,144], index: 3, kind: input, shape index: {}]   ;;  %s2052_s4 = inlined_call_operand.vmem [shape: f32[16,1], index: 4, kind: input, shape index: {}]   ;;  %s2053_s5 = inlined_call_operand.vmem [shape: s32[1,324], index: 5, kind: input, shape index: {}]   ;;  %s2054_s6 = inlined_call_operand.vmem [shape: f32[2,16,324], index: 6, kind: output, shape index: {}]  }
   0x1 LB: > { %s1503_s22 = sadd.s32 4294967295, %s1589_s21   ;;  %p1507_p0 = scmp.ge.s32.totalorder %s1589_s21, 1  ;;  %s1589_s21 = sphi %s1645_s21, %s16_s21  }
   0x2   : > { %p212_p1 = scmp.lt.s32.totalorder %s1589_s21, 3 }
   0x4   : > { %p213_p2 = pnand %p1507_p0, %p212_p1 }
   0x5   : > { %p242_p3 = scmp.lt.s32.totalorder (!%p213_p2), %s1503_s22, 1  ;;  %s1591_s27 = smov (!%p213_p2), 90  }
   0x6   : > { %216 = sbr.rel (%p213_p2) target bundleno = 1329 (0x531), region = 44  ;;  %s1592_s28 = smov (!%p213_p2), 91  }
   0x7   : > { %s1593_s29 = smov (!%p213_p2), 92   ;;  %s1594_s30 = smov (!%p213_p2), 108  }
   0x8   : > { %s1595_s7 = smov (!%p213_p2), 109   ;;  %s1596_s8 = smov (!%p213_p2), 110  }
   0x9   : > { %s1598_s9 = smov (!%p213_p2), 126   ;;  %s1599_s12 = smov (!%p213_p2), 127  }
   0xa   : > { %s1601_s19 = smov (!%p213_p2), 21   ;;  %s1602_s20 = smov (!%p213_p2), 36  }
   0xb   : > { %s2056_s22 = smov (!%p242_p3, %s1503_s22), 1  ;;  %vm257_vm0 = vcmask 556032   ;;  %vm355_vm1 = vcmask 883712   ;;  %v1597_v3 = vmov 0.0   ;;  %v1698_v4 = vld [vmem:[%s2049_s1] sm:$0xff]  ;;  %vm468_vm2 = vcmask 588800  }
   0xc   : > { %s1552_s23 = smul.u32 24, %s2056_s22  ;;  %539 = vmatprep.mubr.f32.mxu0 %v1597_v3  ;;  %633 = vst [vmem:[#allocation4] sm:$0xff] %v1597_v3  ;;  %635 = vst.msk [vmem:[#allocation4 + $0x10] sm:$0xff] %vm355_vm1, %v1597_v3  ;;  %1549 = vmatprep.mubr.msk.f32.mxu1 %vm468_vm2, %v1698_v4  ;;  %v1600_v5 = vmov 0   ;;  %v457_v6 = vld [vmem:[%s2050_s2 + $0x8] sm:$0xff]  ;;  %v456_v7 = vld [vmem:[%s2050_s2] sm:$0xff] }
   0xd   : > { %636 = vst [vmem:[#allocation4 + $0x18] sm:$0xff] %v1597_v3  ;;  %638 = vst.msk [vmem:[#allocation4 + $0x28] sm:$0xff] %vm355_vm1, %v1597_v3  ;;  %1581 = vset.pattern.permute.xlu0 %v1600_v5  ;;  %1582 = vset.pattern.permute.xlu1 %v1600_v5  ;;  %vm418_vm3 = vcmask 736256   ;;  %vm397_vm4 = vcmask 744448   ;;  %vm376_vm5 = vcmask 752640   ;;  %vm334_vm6 = vcmask 891904  }
   0xe   : > { %s246_s26 = scalar_lea.vmem %s2048_s0, %s1552_s23  ;;  %vm313_vm7 = vcmask 900096   ;;  %vm292_vm8 = vcmask 1031168   ;;  %vm271_vm9 = vcmask 1039360   ;;  %v428_v55 = vld [vmem:[%s2049_s1 + $0x8] sm:$0xff]  ;;  %vm668_vm10 = vcmask 1047720   ;;  %s1603_s23 = smov 124  }
   0xf   : > { %v1659_v0 = vld [vmem:[%s246_s26 + $0x8] sm:$0xff]  ;;  %v1661_v1 = vld [vmem:[%s246_s26] sm:$0xff]  ;;  %v408_v2 = vld [vmem:[%s246_s26 + $0x10] sm:$0xff]  ;;  %vm657_vm11 = vcmask 171008   ;;  %vm671_vm12 = vcmask 728064   ;;  %vm686_vm13 = vcmask 162832  }
  0x10   : > { %414 = vrot.lane.b32.xlu0 %v1659_v0, %s1591_s27  ;;  %412 = vrot.lane.b32.xlu1 %v1661_v1, %s1591_s27  ;;  %258 = vst.msk [vmem:[#allocation2 + $0x10] sm:$0xff] %vm257_vm0, %v408_v2  ;;  %vm699_vm14 = vcmask 572832   ;;  %s1604_s26 = smov 2   ;;  %s1609_s10 = smov 88  }
  0x14   : > { %416 = vrot.lane.b32.xlu0 %v408_v2, %s1591_s27  ;;  %393 = vrot.lane.b32.xlu1 %v1659_v0, %s1592_s28 }
  0x17   : > { %v431_v57 = vld [vmem:[#allocation2 + $0x10] sm:$0xff] }
  0x18   : > { %395 = vrot.lane.b32.xlu0 %v408_v2, %s1592_s28  ;;  %391 = vrot.lane.b32.xlu1 %v1661_v1, %s1592_s28  ;;  %s1605_s28 = smov 89  }
  0x1c   : > { %374 = vrot.lane.b32.xlu1 %v408_v2, %s1593_s29  ;;  %372 = vrot.lane.b32.xlu0 %v1659_v0, %s1593_s29 }
  0x20   : > { %370 = vrot.lane.b32.xlu0 %v1661_v1, %s1593_s29  ;;  %351 = vrot.lane.b32.xlu1 %v1659_v0, %s1594_s30 }
  0x24   : > { %353 = vrot.lane.b32.xlu0 %v408_v2, %s1594_s30  ;;  %349 = vrot.lane.b32.xlu1 %v1661_v1, %s1594_s30 }
  0x28   : > { %332 = vrot.lane.b32.xlu1 %v408_v2, %s1595_s7  ;;  %330 = vrot.lane.b32.xlu0 %v1659_v0, %s1595_s7 }
  0x2c   : > { %328 = vrot.lane.b32.xlu0 %v1661_v1, %s1595_s7  ;;  %309 = vrot.lane.b32.xlu1 %v1659_v0, %s1596_s8  ;;  %s1607_s7 = smov 107  }
  0x30   : > { %311 = vrot.lane.b32.xlu0 %v408_v2, %s1596_s8  ;;  %307 = vrot.lane.b32.xlu1 %v1661_v1, %s1596_s8  ;;  %s1608_s8 = smov 125  }
  0x34   : > { %290 = vrot.lane.b32.xlu1 %v408_v2, %s1598_s9  ;;  %288 = vrot.lane.b32.xlu0 %v1659_v0, %s1598_s9 }
  0x38   : > { %286 = vrot.lane.b32.xlu0 %v1661_v1, %s1598_s9  ;;  %267 = vrot.lane.b32.xlu1 %v1659_v0, %s1599_s12 }
  0x3c   : > { %269 = vrot.lane.b32.xlu0 %v408_v2, %s1599_s12  ;;  %265 = vrot.lane.b32.xlu1 %v1661_v1, %s1599_s12 }
  0x40   : > { %465 = vperm.xlu0 %1581, %v457_v6   ;;  %460 = vperm.xlu1 %1582, %v456_v7  }
  0x82   : > { %v415_v8 = vpop.permute.xlu0 %414  ;;  %v413_v9 = vpop.permute.xlu1 %412 }
  0x83   : > { %v419_v10 = vsel %vm418_vm3, %v413_v9, %v415_v8 }
  0x86   : > { %v417_v11 = vpop.permute.xlu0 %416  ;;  %v394_v12 = vpop.permute.xlu1 %393 }
  0x87   : > { %v420_v13 = vsel %vm418_vm3, %v415_v8, %v417_v11  ;;  %426 = vst.msk [vmem:[#allocation2 + $0xd0] sm:$0xff] %vm257_vm0, %v417_v11 }
  0x88   : > { %489 = vmatprep.subr.mxu0 %v420_v13 }
  0x89   : > { %490 = vmatpush1.msra.mxu0 %v419_v10 }
  0x8a   : > { %v396_v14 = vpop.permute.xlu0 %395  ;;  %v392_v15 = vpop.permute.xlu1 %391 }
  0x8b   : > { %v399_v16 = vsel %vm397_vm4, %v394_v12, %v396_v14  ;;  %405 = vst.msk [vmem:[#allocation2 + $0xb8] sm:$0xff] %vm257_vm0, %v396_v14  ;;  %v398_v17 = vsel %vm397_vm4, %v392_v15, %v394_v12  ;;  %vm744_vm4 = vcmask 1014784  }
  0x8c   : > { %491 = vmatprep.subr.mxu0 %v399_v16 }
  0x8d   : > { %492 = vmatpush1.msra.mxu0 %v398_v17 }
  0x8e   : > { %v375_v18 = vpop.permute.xlu1 %374  ;;  %v373_v19 = vpop.permute.xlu0 %372  ;;  %v455_v20 = vld [vmem:[#allocation2 + $0xd0] sm:$0xff] }
  0x8f   : > { %384 = vst.msk [vmem:[#allocation2 + $0xa0] sm:$0xff] %vm257_vm0, %v375_v18  ;;  %v378_v21 = vsel %vm376_vm5, %v373_v19, %v375_v18  ;;  %1531 = vmatprep.subr.mxu1 %v455_v20 }
  0x90   : > { %1532 = vmatpush3.msra.mxu1 %v455_v20  ;;  %493 = vmatprep.subr.mxu0 %v378_v21 }
  0x92   : > { %v371_v22 = vpop.permute.xlu0 %370  ;;  %v352_v23 = vpop.permute.xlu1 %351  ;;  %v452_v24 = vld [vmem:[#allocation2 + $0xb8] sm:$0xff] }
  0x93   : > { %v377_v25 = vsel %vm376_vm5, %v371_v22, %v373_v19  ;;  %1533 = vmatprep.subr.mxu1 %v452_v24 }
  0x94   : > { %1534 = vmatpush3.msra.mxu1 %v452_v24  ;;  %494 = vmatpush1.msra.mxu0 %v377_v25 }
  0x96   : > { %v354_v26 = vpop.permute.xlu0 %353  ;;  %v350_v27 = vpop.permute.xlu1 %349  ;;  %v449_v28 = vld [vmem:[#allocation2 + $0xa0] sm:$0xff] }
  0x97   : > { %v357_v29 = vsel %vm355_vm1, %v352_v23, %v354_v26  ;;  %363 = vst.msk [vmem:[#allocation2 + $0x88] sm:$0xff] %vm257_vm0, %v354_v26  ;;  %v356_v30 = vsel %vm355_vm1, %v350_v27, %v352_v23  ;;  %1535 = vmatprep.subr.mxu1 %v449_v28 }
  0x98   : > { %1536 = vmatpush3.msra.mxu1 %v449_v28  ;;  %495 = vmatprep.subr.mxu0 %v357_v29 }
  0x99   : > { %496 = vmatpush1.msra.mxu0 %v356_v30 }
  0x9a   : > { %v333_v31 = vpop.permute.xlu1 %332  ;;  %v331_v32 = vpop.permute.xlu0 %330 }
  0x9b   : > { %342 = vst.msk [vmem:[#allocation2 + $0x70] sm:$0xff] %vm257_vm0, %v333_v31  ;;  %v336_v33 = vsel %vm334_vm6, %v331_v32, %v333_v31 }
  0x9c   : > { %497 = vmatprep.subr.mxu0 %v336_v33 }
  0x9e   : > { %v329_v34 = vpop.permute.xlu0 %328  ;;  %v310_v35 = vpop.permute.xlu1 %309  ;;  %v446_v36 = vld [vmem:[#allocation2 + $0x88] sm:$0xff] }
  0x9f   : > { %v335_v37 = vsel %vm334_vm6, %v329_v34, %v331_v32  ;;  %1537 = vmatprep.subr.mxu1 %v446_v36 }
  0xa0   : > { %1538 = vmatpush3.msra.mxu1 %v446_v36  ;;  %498 = vmatpush1.msra.mxu0 %v335_v37 }
  0xa2   : > { %v312_v38 = vpop.permute.xlu0 %311  ;;  %v308_v39 = vpop.permute.xlu1 %307  ;;  %v443_v40 = vld [vmem:[#allocation2 + $0x70] sm:$0xff] }
  0xa3   : > { %v315_v41 = vsel %vm313_vm7, %v310_v35, %v312_v38  ;;  %321 = vst.msk [vmem:[#allocation2 + $0x58] sm:$0xff] %vm257_vm0, %v312_v38  ;;  %v314_v42 = vsel %vm313_vm7, %v308_v39, %v310_v35  ;;  %1539 = vmatprep.subr.mxu1 %v443_v40 }
  0xa4   : > { %1540 = vmatpush3.msra.mxu1 %v443_v40  ;;  %499 = vmatprep.subr.mxu0 %v315_v41  ;;  %v711_v41 = vlaneseq }
  0xa5   : > { %500 = vmatpush1.msra.mxu0 %v314_v42 }
  0xa6   : > { %v291_v43 = vpop.permute.xlu1 %290  ;;  %v289_v44 = vpop.permute.xlu0 %288 }
  0xa7   : > { %300 = vst.msk [vmem:[#allocation2 + $0x40] sm:$0xff] %vm257_vm0, %v291_v43  ;;  %v294_v45 = vsel %vm292_vm8, %v289_v44, %v291_v43 }
  0xa8   : > { %501 = vmatprep.subr.mxu0 %v294_v45  ;;  %v712_v45 = vshrl.u32 %v711_v41, 7 }
  0xaa   : > { %v287_v46 = vpop.permute.xlu0 %286  ;;  %v268_v47 = vpop.permute.xlu1 %267  ;;  %v440_v48 = vld [vmem:[#allocation2 + $0x58] sm:$0xff] }
  0xab   : > { %v293_v49 = vsel %vm292_vm8, %v287_v46, %v289_v44  ;;  %1541 = vmatprep.subr.mxu1 %v440_v48  ;;  %v702_v44 = vld [vmem:[%s2053_s5] sm:$0x7] }
  0xac   : > { %1542 = vmatpush3.msra.mxu1 %v440_v48  ;;  %502 = vmatpush1.msra.mxu0 %v293_v49  ;;  %vm709_vm15 = vcmp.eq.s32.totalorder %v702_v44, 0  ;;  %v713_v48 = vsub.s32 0, %v712_v45 }
  0xae   : > { %v270_v50 = vpop.permute.xlu0 %269  ;;  %v266_v51 = vpop.permute.xlu1 %265  ;;  %v437_v52 = vld [vmem:[#allocation2 + $0x40] sm:$0xff] }
  0xaf   : > { %v273_v53 = vsel %vm271_vm9, %v268_v47, %v270_v50  ;;  %279 = vst.msk [vmem:[#allocation2 + $0x28] sm:$0xff] %vm257_vm0, %v270_v50  ;;  %v272_v54 = vsel %vm271_vm9, %v266_v51, %v268_v47  ;;  %1543 = vmatprep.subr.mxu1 %v437_v52  ;;  %v710_v50 = vsel %vm709_vm15, 1, %v1600_v5  ;;  %v721_v51 = vsub.s32 2, %v712_v45 }
  0xb0   : > { %1544 = vmatpush3.msra.mxu1 %v437_v52  ;;  %503 = vmatprep.subr.mxu0 %v273_v53  ;;  %v717_v52 = vsub.s32 1, %v712_v45  ;;  %vm838_vm15 = vcmask 572416  }
  0xb1   : > { %504 = vmatpush1.msra.mxu0 %v272_v54  ;;  %v714_v54 = vrot.slane %v710_v50, %v713_v48 }
  0xb2   : > { %505 = vmatprep.subr.mxu0 %v1659_v0 }
  0xb3   : > { %506 = vmatpush1.msra.mxu0 %v1661_v1  ;;  %vm723_vm5 = vcmp.eq.s32.totalorder %v714_v54, 1 }
  0xb4   : > { %1510 = vmatmul.mubr.msk.f32.vlgmr.msra.gmra.mxu0 %vm468_vm2, %v1698_v4 }
  0xb5   : > { %545 = vmatprep.mubr.f32.mxu0 %v1597_v3 }
  0xb6   : > { %v434_v56 = vld [vmem:[#allocation2 + $0x28] sm:$0xff] }
  0xb7   : > { %1545 = vmatprep.subr.mxu1 %v434_v56 }
  0xb8   : > { %1546 = vmatpush3.msra.mxu1 %v434_v56  ;;  %1511 = vmatmul.mubr.msk.f32.gmra.mxu0 %vm468_vm2, %v428_v55  ;;  %v722_v56 = vrot.slane %v710_v50, %v721_v51 }
  0xb9   : > { %1547 = vmatprep.subr.mxu1 %v431_v57 }
  0xba   : > { %1548 = vmatpush3.msra.mxu1 %v431_v57  ;;  %vm725_vm6 = vcmp.eq.s32.totalorder %v722_v56, 1 }
  0xbb   : > { %1550 = vmatmul.mubr.msk.f32.vlgmr.msra.gmra.mxu1 %vm468_vm2, %v428_v55  ;;  %1361 = vmatprep.subr.mxu1 %v1597_v3  ;;  %v466_v59 = vpop.permute.xlu0 %465  ;;  %v461_v1 = vpop.permute.xlu1 %460  ;;  %vm783_vm2 = vcmp.eq.s32.totalorder %v702_v44, 17 }
  0xbc   : > { %v784_v55 = vsel %vm783_vm2, 1, %v1600_v5  ;;  %vm1277_vm2 = vcmask 130048  }
 0x174   : > { %v541_v58 = vpop.f32.mrf.mxu0 }
 0x175   : > { %v542_v12 = vadd.f32 %v541_v58, %v461_v1  ;;  %v718_v58 = vrot.slane %v710_v50, %v717_v52 }
 0x176   : > { %v543_v60 = vpop.f32.mrf.mxu0 }
 0x177   : > { %v544_v10 = vadd.f32 %v543_v60, %v461_v1  ;;  %v627_v15 = vmax.f32 %v542_v12, 0.0  ;;  %v792_v60 = vrot.slane %v784_v55, %v717_v52  ;;  %vm724_vm7 = vcmp.eq.s32.totalorder %v718_v58, 1 }
 0x178   : > { %v547_v61 = vpop.f32.mrf.mxu0 }
 0x179   : > { %v548_v62 = vadd.f32 %v547_v61, %v466_v59  ;;  %v628_v13 = vmax.f32 %v544_v10, 0.0 }
 0x17a   : > { %v549_v63 = vpop.f32.mrf.mxu0 }
 0x17b   : > { %v1551_v0 = vpop.f32.mrf.mxu1  ;;  %v630_v2 = vmax.f32 %v548_v62, 0.0  ;;  %v550_v4 = vadd.f32 %v549_v63, %v466_v59 }
 0x17c   : > { %v624_v6 = vadd.f32 %v1551_v0, %v466_v59  ;;  %v788_v59 = vrot.slane %v784_v55, %v713_v48  ;;  %v796_v0 = vrot.slane %v784_v55, %v721_v51 }
 0x17d   : > { %v618_v7 = vpop.f32.mrf.mxu1  ;;  %v631_v8 = vmax.f32 %v550_v4, 0.0  ;;  %651 = vrot.lane.b32.xlu1 %v630_v2, %s1601_s19 }
 0x17e   : > { %v632_v9 = vmax.f32 %v624_v6, 0.0  ;;  %v619_v11 = vadd.f32 %v618_v7, %v461_v1  ;;  %vm797_vm9 = vcmp.eq.s32.totalorder %v788_v59, 1 }
 0x180   : > { %655 = vrot.lane.b32.xlu0 %v632_v9, %s1601_s19  ;;  %v629_v14 = vmax.f32 %v619_v11, 0.0 }
 0x181   : > { %653 = vrot.lane.b32.xlu1 %v631_v8, %s1601_s19 }
 0x184   : > { %647 = vrot.lane.b32.xlu0 %v628_v13, %s1601_s19 }
 0x185   : > { %649 = vrot.lane.b32.xlu1 %v629_v14, %s1601_s19 }
 0x188   : > { %645 = vrot.lane.b32.xlu0 %v627_v15, %s1601_s19 }
 0x1ef   : > { %v652_v16 = vpop.permute.xlu1 %651 }
 0x1f0   : > { %673 = vst.msk [vmem:[#allocation4 + $0x18] sm:$0xff] %vm668_vm10, %v652_v16 }
 0x1f2   : > { %v656_v17 = vpop.permute.xlu0 %655 }
 0x1f3   : > { %v654_v18 = vpop.permute.xlu1 %653 }
 0x1f4   : > { %v661_v19 = vsel %vm657_vm11, %v654_v18, %v656_v17  ;;  %v1753_v29 = vsel %vm657_vm11, %v652_v16, %v654_v18 }
 0x1f5   : > { %675 = vst.msk [vmem:[#allocation4 + $0x28] sm:$0xff] %vm671_vm12, %v661_v19 }
 0x1f6   : > { %v648_v20 = vpop.permute.xlu0 %647 }
 0x1f7   : > { %v650_v21 = vpop.permute.xlu1 %649  ;;  %v677_v22 = vld [vmem:[#allocation4 + $0x18] sm:$0xff] }
 0x1f8   : > { %v659_v23 = vsel %vm657_vm11, %v648_v20, %v650_v21  ;;  %682 = vrot.lane.b32.xlu1 %v677_v22, %s1593_s29 }
 0x1f9   : > { %672 = vst.msk [vmem:[#allocation4 + $0x10] sm:$0xff] %vm671_vm12, %v659_v23 }
 0x1fa   : > { %v646_v24 = vpop.permute.xlu0 %645 }
 0x1fb   : > { %669 = vst.msk [vmem:[#allocation4] sm:$0xff] %vm668_vm10, %v646_v24  ;;  %v1748_v28 = vsel %vm657_vm11, %v646_v24, %v648_v20  ;;  %vm798_vm10 = vcmp.eq.s32.totalorder %v792_v60, 1  ;;  %vm799_vm11 = vcmp.eq.s32.totalorder %v796_v0, 1 }
 0x1fc   : > { %v690_v25 = vld [vmem:[#allocation4 + $0x28] sm:$0xff] }
 0x1fd   : > { %695 = vrot.lane.b32.xlu0 %v690_v25, %s1602_s20 }
 0x200   : > { %v689_v26 = vld [vmem:[#allocation4 + $0x10] sm:$0xff] }
 0x201   : > { %693 = vrot.lane.b32.xlu0 %v689_v26, %s1602_s20  ;;  %s1553_s20 = smul.u32 48, %s2056_s22 }
 0x202   : > { %v676_v27 = vld [vmem:[#allocation4] sm:$0xff] }
 0x203   : > { %680 = vrot.lane.b32.xlu1 %v676_v27, %s1593_s29  ;;  %s1606_s29 = smov 106   ;;  %s251_s25 = scalar_lea.vmem %s2054_s6, %s1553_s20 }
 0x205   : > { %734 = vrot.lane.b32.xlu0 %v1748_v28, %s1603_s23 }
 0x207   : > { %763 = vrot.lane.b32.xlu1 %v1753_v29, %s1598_s9 }
 0x209   : > { %740 = vrot.lane.b32.xlu0 %v1753_v29, %s1603_s23 }
 0x26a   : > { %v683_v30 = vpop.permute.xlu1 %682 }
 0x26b   : > { %688 = vst.msk [vmem:[#allocation4 + $0x18] sm:$0xff] %vm686_vm13, %v683_v30 }
 0x26f   : > { %v696_v31 = vpop.permute.xlu0 %695 }
 0x270   : > { %701 = vst.msk [vmem:[#allocation4 + $0x28] sm:$0xff] %vm699_vm14, %v696_v31 }
 0x272   : > { %v1761_v35 = vld [vmem:[#allocation4 + $0x18] sm:$0xff] }
 0x273   : > { %v694_v32 = vpop.permute.xlu0 %693 }
 0x274   : > { %700 = vst.msk [vmem:[#allocation4 + $0x10] sm:$0xff] %vm699_vm14, %v694_v32  ;;  %vm835_vm14 = vcmask 1047568  }
 0x275   : > { %v681_v33 = vpop.permute.xlu1 %680 }
 0x276   : > { %687 = vst.msk [vmem:[#allocation4] sm:$0xff] %vm686_vm13, %v681_v33  ;;  %vm824_vm13 = vcmask 15360  }
 0x277   : > { %v1766_v37 = vld [vmem:[#allocation4 + $0x28] sm:$0xff]  ;;  %v735_v38 = vpop.permute.xlu0 %734 }
 0x279   : > { %v764_v39 = vpop.permute.xlu1 %763 }
 0x27b   : > { %v705_v36 = vld [vmem:[#allocation4 + $0x10] sm:$0xff]  ;;  %v741_v40 = vpop.permute.xlu0 %740 }
 0x27d   : > { %v703_v34 = vld [vmem:[#allocation4] sm:$0xff] }
 0x27e   : > { %732 = vrot.lane.b32.xlu1 %v703_v34, %s1603_s23  ;;  %755 = vrot.lane.b32.xlu0 %v703_v34, %s1598_s9 }
 0x282   : > { %761 = vrot.lane.b32.xlu0 %v1761_v35, %s1598_s9  ;;  %736 = vrot.lane.b32.xlu1 %v705_v36, %s1603_s23 }
 0x286   : > { %765 = vrot.lane.b32.xlu0 %v1766_v37, %s1598_s9  ;;  %738 = vrot.lane.b32.xlu1 %v1761_v35, %s1603_s23 }
 0x28a   : > { %759 = vrot.lane.b32.xlu0 %v705_v36, %s1598_s9  ;;  %742 = vrot.lane.b32.xlu1 %v1766_v37, %s1603_s23 }
 0x28e   : > { %757 = vrot.lane.b32.xlu1 %v1748_v28, %s1598_s9 }
 0x2f0   : > { %v733_v42 = vpop.permute.xlu1 %732  ;;  %v756_v43 = vpop.permute.xlu0 %755 }
 0x2f1   : > { %v745_v61 = vsel %vm744_vm4, %v733_v42, %v735_v38 }
 0x2f4   : > { %v762_v46 = vpop.permute.xlu0 %761  ;;  %v737_v47 = vpop.permute.xlu1 %736 }
 0x2f5   : > { %v746_v1 = vsel %vm744_vm4, %v735_v38, %v737_v47  ;;  %v769_v8 = vsel %vm292_vm8, %v762_v46, %v764_v39 }
 0x2f8   : > { %v739_v49 = vpop.permute.xlu1 %738  ;;  %v766_v53 = vpop.permute.xlu0 %765 }
 0x2f9   : > { %v747_v2 = vsel %vm744_vm4, %v739_v49, %v741_v40  ;;  %v770_v14 = vsel %vm292_vm8, %v764_v39, %v766_v53 }
 0x2fa   : > { %v780_v12 = vsel %vm723_vm5, %v747_v2, %v769_v8 }
 0x2fb   : > { %v803_v16 = vsel %vm797_vm9, %v1761_v35, %v780_v12  ;;  %v1208_v35 = vld [vmem:[%s2051_s3 + $0x8] sm:$0xff] }
 0x2fc   : > { %v743_v57 = vpop.permute.xlu1 %742  ;;  %v760_v62 = vpop.permute.xlu0 %759  ;;  %1516 = vmatprep.mubr.msk.f32.mxu1 %vm1277_vm2, %v1208_v35  ;;  %1514 = vmatprep.mubr.msk.f32.mxu0 %vm1277_vm2, %v1208_v35 }
 0x2fd   : > { %v779_v11 = vsel %vm725_vm6, %v737_v47, %v760_v62  ;;  %v748_v13 = vsel %vm744_vm4, %v741_v40, %v743_v57  ;;  %v782_v17 = vsel %vm725_vm6, %v743_v57, %v766_v53  ;;  %vm1028_vm6 = vcmask 875520  }
 0x2fe   : > { %v802_v15 = vsel %vm799_vm11, %v705_v36, %v779_v11  ;;  %v781_v18 = vsel %vm724_vm7, %v748_v13, %v770_v14  ;;  %v805_v20 = vsel %vm799_vm11, %v1766_v37, %v782_v17  ;;  %v1266_v36 = vld [vmem:[%s2052_s4 + $0x8] sm:$0xff]  ;;  %v1265_v37 = vld [vmem:[%s2052_s4] sm:$0xff] }
 0x2ff   : > { %v804_v19 = vsel %vm798_vm10, %v1753_v29, %v781_v18 }
 0x300   : > { %v758_v63 = vpop.permute.xlu1 %757 }
 0x301   : > { %v767_v5 = vsel %vm292_vm8, %v756_v43, %v758_v63  ;;  %v768_v4 = vsel %vm292_vm8, %v758_v63, %v760_v62 }
 0x302   : > { %v777_v6 = vsel %vm723_vm5, %v745_v61, %v767_v5  ;;  %v778_v7 = vsel %vm724_vm7, %v746_v1, %v768_v4  ;;  %vm1069_vm5 = vcmask 867328   ;;  %vm907_vm7 = vcmask 1022976  }
 0x303   : > { %v800_v9 = vsel %vm797_vm9, %v703_v34, %v777_v6  ;;  %v801_v10 = vsel %vm798_vm10, %v1748_v28, %v778_v7 }
 0x304   : > { %812 = vrot.lane.b32.xlu0 %v800_v9, %s1604_s26  ;;  %814 = vrot.lane.b32.xlu1 %v801_v10, %s1604_s26 }
 0x308   : > { %816 = vrot.lane.b32.xlu0 %v802_v15, %s1604_s26  ;;  %818 = vrot.lane.b32.xlu1 %v803_v16, %s1604_s26 }
 0x30c   : > { %820 = vrot.lane.b32.xlu0 %v804_v19, %s1604_s26  ;;  %822 = vrot.lane.b32.xlu1 %v805_v20, %s1604_s26 }
 0x376   : > { %v815_v21 = vpop.permute.xlu1 %814  ;;  %v813_v22 = vpop.permute.xlu0 %812 }
 0x377   : > { %v825_v23 = vsel %vm824_vm13, %v813_v22, %v815_v21  ;;  %836 = vst.msk [vmem:[#allocation4] sm:$0xff] %vm835_vm14, %v813_v22 }
 0x37a   : > { %v819_v24 = vpop.permute.xlu1 %818  ;;  %v817_v25 = vpop.permute.xlu0 %816 }
 0x37b   : > { %840 = vst.msk [vmem:[#allocation4 + $0x18] sm:$0xff] %vm835_vm14, %v819_v24  ;;  %v826_v26 = vsel %vm824_vm13, %v815_v21, %v817_v25 }
 0x37c   : > { %839 = vst.msk [vmem:[#allocation4 + $0x10] sm:$0xff] %vm838_vm15, %v826_v26 }
 0x37e   : > { %v823_v27 = vpop.permute.xlu1 %822  ;;  %v821_v28 = vpop.permute.xlu0 %820  ;;  %v1804_v29 = vld [vmem:[#allocation4] sm:$0xff] }
 0x37f   : > { %v1807_v30 = vsel %vm824_vm13, %v819_v24, %v821_v28  ;;  %v828_v31 = vsel %vm824_vm13, %v821_v28, %v823_v27  ;;  %1138 = vrot.lane.b32.xlu0 %v1804_v29, %s1605_s28 }
 0x380   : > { %842 = vst.msk [vmem:[#allocation4 + $0x28] sm:$0xff] %vm838_vm15, %v828_v31 }
 0x382   : > { %v1129_v32 = vld [vmem:[#allocation4 + $0x18] sm:$0xff] }
 0x383   : > { %1144 = vrot.lane.b32.xlu1 %v1129_v32, %s1605_s28  ;;  %1098 = vrot.lane.b32.xlu0 %v1804_v29, %s1591_s27  ;;  %v1128_v33 = vld [vmem:[#allocation4 + $0x10] sm:$0xff] }
 0x387   : > { %1057 = vrot.lane.b32.xlu0 %v1804_v29, %s1606_s29  ;;  %1142 = vrot.lane.b32.xlu1 %v1128_v33, %s1605_s28  ;;  %v1131_v34 = vld [vmem:[#allocation4 + $0x28] sm:$0xff] }
 0x38b   : > { %1016 = vrot.lane.b32.xlu0 %v1804_v29, %s1607_s7  ;;  %1104 = vrot.lane.b32.xlu1 %v1129_v32, %s1591_s27 }
 0x38f   : > { %976 = vrot.lane.b32.xlu0 %v1804_v29, %s1594_s30  ;;  %1102 = vrot.lane.b32.xlu1 %v1128_v33, %s1591_s27 }
 0x393   : > { %936 = vrot.lane.b32.xlu0 %v1804_v29, %s1603_s23  ;;  %1063 = vrot.lane.b32.xlu1 %v1129_v32, %s1606_s29 }
 0x397   : > { %895 = vrot.lane.b32.xlu0 %v1804_v29, %s1608_s8  ;;  %1061 = vrot.lane.b32.xlu1 %v1128_v33, %s1606_s29 }
 0x39b   : > { %855 = vrot.lane.b32.xlu0 %v1804_v29, %s1598_s9  ;;  %1022 = vrot.lane.b32.xlu1 %v1129_v32, %s1607_s7 }
 0x39f   : > { %1140 = vrot.lane.b32.xlu0 %v825_v23, %s1605_s28  ;;  %1020 = vrot.lane.b32.xlu1 %v1128_v33, %s1607_s7 }
 0x3a3   : > { %1100 = vrot.lane.b32.xlu0 %v825_v23, %s1591_s27  ;;  %982 = vrot.lane.b32.xlu1 %v1129_v32, %s1594_s30 }
 0x3a7   : > { %1059 = vrot.lane.b32.xlu0 %v825_v23, %s1606_s29  ;;  %980 = vrot.lane.b32.xlu1 %v1128_v33, %s1594_s30 }
 0x3ab   : > { %1018 = vrot.lane.b32.xlu0 %v825_v23, %s1607_s7  ;;  %942 = vrot.lane.b32.xlu1 %v1129_v32, %s1603_s23 }
 0x3af   : > { %978 = vrot.lane.b32.xlu0 %v825_v23, %s1594_s30  ;;  %940 = vrot.lane.b32.xlu1 %v1128_v33, %s1603_s23 }
 0x3b3   : > { %938 = vrot.lane.b32.xlu0 %v825_v23, %s1603_s23  ;;  %901 = vrot.lane.b32.xlu1 %v1129_v32, %s1608_s8 }
 0x3b7   : > { %897 = vrot.lane.b32.xlu0 %v825_v23, %s1608_s8  ;;  %899 = vrot.lane.b32.xlu1 %v1128_v33, %s1608_s8 }
 0x3bb   : > { %857 = vrot.lane.b32.xlu0 %v825_v23, %s1598_s9  ;;  %861 = vrot.lane.b32.xlu1 %v1129_v32, %s1598_s9 }
 0x3bf   : > { %1180 = vrot.lane.b32.xlu0 %v825_v23, %s1609_s10  ;;  %859 = vrot.lane.b32.xlu1 %v1128_v33, %s1598_s9 }
 0x3c3   : > { %1184 = vrot.lane.b32.xlu1 %v1129_v32, %s1609_s10  ;;  %1148 = vrot.lane.b32.xlu0 %v1131_v34, %s1605_s28 }
 0x3c7   : > { %1108 = vrot.lane.b32.xlu0 %v1131_v34, %s1591_s27  ;;  %1146 = vrot.lane.b32.xlu1 %v1807_v30, %s1605_s28 }
 0x3cb   : > { %1067 = vrot.lane.b32.xlu0 %v1131_v34, %s1606_s29  ;;  %1106 = vrot.lane.b32.xlu1 %v1807_v30, %s1591_s27 }
 0x3cf   : > { %1026 = vrot.lane.b32.xlu0 %v1131_v34, %s1607_s7  ;;  %1065 = vrot.lane.b32.xlu1 %v1807_v30, %s1606_s29 }
 0x3d3   : > { %986 = vrot.lane.b32.xlu0 %v1131_v34, %s1594_s30  ;;  %1024 = vrot.lane.b32.xlu1 %v1807_v30, %s1607_s7 }
 0x3d7   : > { %946 = vrot.lane.b32.xlu0 %v1131_v34, %s1603_s23  ;;  %984 = vrot.lane.b32.xlu1 %v1807_v30, %s1594_s30 }
 0x3db   : > { %905 = vrot.lane.b32.xlu0 %v1131_v34, %s1608_s8  ;;  %944 = vrot.lane.b32.xlu1 %v1807_v30, %s1603_s23 }
 0x3df   : > { %865 = vrot.lane.b32.xlu0 %v1131_v34, %s1598_s9  ;;  %903 = vrot.lane.b32.xlu1 %v1807_v30, %s1608_s8 }
 0x3e3   : > { %1188 = vrot.lane.b32.xlu0 %v1131_v34, %s1609_s10  ;;  %863 = vrot.lane.b32.xlu1 %v1807_v30, %s1598_s9 }
 0x3e7   : > { %1178 = vrot.lane.b32.xlu0 %v1804_v29, %s1609_s10  ;;  %1186 = vrot.lane.b32.xlu1 %v1807_v30, %s1609_s10 }
 0x3eb   : > { %1274 = vperm.xlu0 %1581, %v1266_v36   ;;  %1182 = vrot.lane.b32.xlu1 %v1128_v33, %s1609_s10 }
 0x3ef   : > { %1269 = vperm.xlu1 %1582, %v1265_v37  }
 0x3f1   : > { %v1139_v38 = vpop.permute.xlu0 %1138 }
 0x3f5   : > { %v1887_v39 = vpop.permute.xlu1 %1144  ;;  %v1099_v40 = vpop.permute.xlu0 %1098 }
 0x3f9   : > { %v1143_v41 = vpop.permute.xlu1 %1142  ;;  %v1058_v42 = vpop.permute.xlu0 %1057 }
 0x3fa   : > { %1162 = vst.msk [vmem:[#allocation3 + $0x160] sm:$0xff] %vm257_vm0, %v1143_v41 }
 0x3fd   : > { %v1890_v43 = vpop.permute.xlu1 %1104  ;;  %v1017_v44 = vpop.permute.xlu0 %1016 }
 0x401   : > { %v1103_v45 = vpop.permute.xlu1 %1102  ;;  %v977_v46 = vpop.permute.xlu0 %976  ;;  %v1255_v35 = vld [vmem:[#allocation3 + $0x160] sm:$0xff] }
 0x402   : > { %1122 = vst.msk [vmem:[#allocation3 + $0x130] sm:$0xff] %vm257_vm0, %v1103_v45 }
 0x405   : > { %v1893_v47 = vpop.permute.xlu1 %1063  ;;  %v937_v48 = vpop.permute.xlu0 %936 }
 0x409   : > { %v1062_v49 = vpop.permute.xlu1 %1061  ;;  %v896_v50 = vpop.permute.xlu0 %895 }
 0x40a   : > { %1082 = vst.msk [vmem:[#allocation3 + $0x100] sm:$0xff] %vm257_vm0, %v1062_v49 }
 0x40d   : > { %v1896_v51 = vpop.permute.xlu1 %1022  ;;  %v856_v52 = vpop.permute.xlu0 %855 }
 0x411   : > { %v1021_v53 = vpop.permute.xlu1 %1020  ;;  %v1141_v54 = vpop.permute.xlu0 %1140 }
 0x412   : > { %1041 = vst.msk [vmem:[#allocation3 + $0xd0] sm:$0xff] %vm257_vm0, %v1021_v53  ;;  %v1150_v55 = vsel %vm671_vm12, %v1139_v38, %v1141_v54  ;;  %v1151_v56 = vsel %vm671_vm12, %v1141_v54, %v1143_v41  ;;  %v1249_v41 = vld [vmem:[#allocation3 + $0x130] sm:$0xff] }
 0x415   : > { %v1901_v57 = vpop.permute.xlu1 %982  ;;  %v1101_v58 = vpop.permute.xlu0 %1100 }
 0x416   : > { %v1904_v59 = vsel %vm418_vm3, %v1099_v40, %v1101_v58  ;;  %v1111_v60 = vsel %vm418_vm3, %v1101_v58, %v1103_v45 }
 0x419   : > { %v981_v61 = vpop.permute.xlu1 %980  ;;  %v1060_v62 = vpop.permute.xlu0 %1059 }
 0x41a   : > { %1000 = vst.msk [vmem:[#allocation3 + $0xa0] sm:$0xff] %vm257_vm0, %v981_v61  ;;  %v1909_v63 = vsel %vm1069_vm5, %v1058_v42, %v1060_v62  ;;  %v1912_v0 = vsel %vm1069_vm5, %v1060_v62, %v1062_v49 }
 0x41d   : > { %v1914_v1 = vpop.permute.xlu1 %942  ;;  %v1019_v2 = vpop.permute.xlu0 %1018 }
 0x41e   : > { %v1917_v5 = vsel %vm1028_vm6, %v1017_v44, %v1019_v2  ;;  %v1920_v4 = vsel %vm1028_vm6, %v1019_v2, %v1021_v53  ;;  %v1237_v53 = vld [vmem:[#allocation3 + $0xd0] sm:$0xff] }
 0x421   : > { %v941_v6 = vpop.permute.xlu1 %940  ;;  %v979_v7 = vpop.permute.xlu0 %978 }
 0x422   : > { %960 = vst.msk [vmem:[#allocation3 + $0x70] sm:$0xff] %vm257_vm0, %v941_v6  ;;  %v1924_v8 = vsel %vm355_vm1, %v977_v46, %v979_v7  ;;  %v1927_v9 = vsel %vm355_vm1, %v979_v7, %v981_v61 }
 0x425   : > { %v1929_v10 = vpop.permute.xlu1 %901  ;;  %v939_v11 = vpop.permute.xlu0 %938 }
 0x426   : > { %v1932_v12 = vsel %vm744_vm4, %v937_v48, %v939_v11  ;;  %v1935_v13 = vsel %vm744_vm4, %v939_v11, %v941_v6 }
 0x429   : > { %v900_v14 = vpop.permute.xlu1 %899  ;;  %v898_v15 = vpop.permute.xlu0 %897 }
 0x42a   : > { %920 = vst.msk [vmem:[#allocation3 + $0x40] sm:$0xff] %vm257_vm0, %v900_v14  ;;  %v1939_v16 = vsel %vm907_vm7, %v896_v50, %v898_v15  ;;  %v1942_v17 = vsel %vm907_vm7, %v898_v15, %v900_v14 }
 0x42d   : > { %v1944_v18 = vpop.permute.xlu1 %861  ;;  %v858_v19 = vpop.permute.xlu0 %857 }
 0x42e   : > { %v1947_v20 = vsel %vm292_vm8, %v856_v52, %v858_v19 }
 0x431   : > { %v860_v21 = vpop.permute.xlu1 %859  ;;  %v1949_v22 = vpop.permute.xlu0 %1180 }
 0x432   : > { %v1952_v23 = vsel %vm292_vm8, %v858_v19, %v860_v21  ;;  %879 = vst.msk [vmem:[#allocation3 + $0x10] sm:$0xff] %vm257_vm0, %v860_v21  ;;  %v1207_v19 = vld [vmem:[%s2051_s3] sm:$0xff]  ;;  %v1209_v21 = vld [vmem:[%s2051_s3 + $0x10] sm:$0xff] }
 0x435   : > { %v1955_v24 = vpop.permute.xlu1 %1184  ;;  %v1149_v25 = vpop.permute.xlu0 %1148 }
 0x436   : > { %1165 = vst.msk [vmem:[#allocation3 + $0x178] sm:$0xff] %vm257_vm0, %v1149_v25 }
 0x439   : > { %v1147_v26 = vpop.permute.xlu1 %1146  ;;  %v1109_v27 = vpop.permute.xlu0 %1108  ;;  %v1213_v15 = vld [vmem:[#allocation3 + $0x10] sm:$0xff] }
 0x43a   : > { %v1152_v28 = vsel %vm671_vm12, %v1887_v39, %v1147_v26  ;;  %v1153_v29 = vsel %vm671_vm12, %v1147_v26, %v1149_v25  ;;  %1125 = vst.msk [vmem:[#allocation3 + $0x148] sm:$0xff] %vm257_vm0, %v1109_v27 }
 0x43b   : > { %1284 = vmatprep.subr.mxu0 %v1153_v29 }
 0x43c   : > { %1285 = vmatpush1.msra.mxu0 %v1152_v28 }
 0x43d   : > { %v1107_v30 = vpop.permute.xlu1 %1106  ;;  %v1068_v31 = vpop.permute.xlu0 %1067  ;;  %v1258_v32 = vld [vmem:[#allocation3 + $0x178] sm:$0xff]  ;;  %1286 = vmatprep.subr.mxu0 %v1151_v56 }
 0x43e   : > { %v1112_v33 = vsel %vm418_vm3, %v1890_v43, %v1107_v30  ;;  %v1113_v34 = vsel %vm418_vm3, %v1107_v30, %v1109_v27  ;;  %1085 = vst.msk [vmem:[#allocation3 + $0x118] sm:$0xff] %vm257_vm0, %v1068_v31  ;;  %1362 = vmatpush1.msra.mxu1 %v1258_v32  ;;  %1287 = vmatpush1.msra.mxu0 %v1150_v55 }
 0x43f   : > { %1363 = vmatprep.subr.mxu1 %v1597_v3  ;;  %1288 = vmatprep.subr.mxu0 %v1113_v34 }
 0x440   : > { %1364 = vmatpush1.msra.mxu1 %v1255_v35  ;;  %1289 = vmatpush1.msra.mxu0 %v1112_v33 }
 0x441   : > { %v1066_v36 = vpop.permute.xlu1 %1065  ;;  %1365 = vmatprep.subr.mxu1 %v1597_v3  ;;  %v1027_v37 = vpop.permute.xlu0 %1026  ;;  %v1252_v38 = vld [vmem:[#allocation3 + $0x148] sm:$0xff]  ;;  %1290 = vmatprep.subr.mxu0 %v1111_v60 }
 0x442   : > { %v1072_v39 = vsel %vm1069_vm5, %v1893_v47, %v1066_v36  ;;  %v1073_v40 = vsel %vm1069_vm5, %v1066_v36, %v1068_v31  ;;  %1044 = vst.msk [vmem:[#allocation3 + $0xe8] sm:$0xff] %vm257_vm0, %v1027_v37  ;;  %1366 = vmatpush1.msra.mxu1 %v1252_v38  ;;  %1291 = vmatpush1.msra.mxu0 %v1904_v59  ;;  %v1243_v47 = vld [vmem:[#allocation3 + $0x100] sm:$0xff] }
 0x443   : > { %1367 = vmatprep.subr.mxu1 %v1597_v3  ;;  %1292 = vmatprep.subr.mxu0 %v1073_v40  ;;  %v1231_v59 = vld [vmem:[#allocation3 + $0xa0] sm:$0xff] }
 0x444   : > { %1368 = vmatpush1.msra.mxu1 %v1249_v41  ;;  %1293 = vmatpush1.msra.mxu0 %v1072_v39 }
 0x445   : > { %v1025_v42 = vpop.permute.xlu1 %1024  ;;  %1369 = vmatprep.subr.mxu1 %v1597_v3  ;;  %v987_v43 = vpop.permute.xlu0 %986  ;;  %v1246_v44 = vld [vmem:[#allocation3 + $0x118] sm:$0xff]  ;;  %1294 = vmatprep.subr.mxu0 %v1912_v0 }
 0x446   : > { %v1031_v45 = vsel %vm1028_vm6, %v1896_v51, %v1025_v42  ;;  %v1032_v46 = vsel %vm1028_vm6, %v1025_v42, %v1027_v37  ;;  %1003 = vst.msk [vmem:[#allocation3 + $0xb8] sm:$0xff] %vm257_vm0, %v987_v43  ;;  %1370 = vmatpush1.msra.mxu1 %v1246_v44  ;;  %1295 = vmatpush1.msra.mxu0 %v1909_v63 }
 0x447   : > { %1371 = vmatprep.subr.mxu1 %v1597_v3  ;;  %1296 = vmatprep.subr.mxu0 %v1032_v46 }
 0x448   : > { %1372 = vmatpush1.msra.mxu1 %v1243_v47  ;;  %1297 = vmatpush1.msra.mxu0 %v1031_v45 }
 0x449   : > { %v985_v48 = vpop.permute.xlu1 %984  ;;  %1373 = vmatprep.subr.mxu1 %v1597_v3  ;;  %v947_v49 = vpop.permute.xlu0 %946  ;;  %v1240_v50 = vld [vmem:[#allocation3 + $0xe8] sm:$0xff]  ;;  %1298 = vmatprep.subr.mxu0 %v1920_v4 }
 0x44a   : > { %v990_v51 = vsel %vm355_vm1, %v1901_v57, %v985_v48  ;;  %v991_v52 = vsel %vm355_vm1, %v985_v48, %v987_v43  ;;  %963 = vst.msk [vmem:[#allocation3 + $0x88] sm:$0xff] %vm257_vm0, %v947_v49  ;;  %1374 = vmatpush1.msra.mxu1 %v1240_v50  ;;  %1299 = vmatpush1.msra.mxu0 %v1917_v5  ;;  %vm1190_vm1 = vcmask 719872  }
 0x44b   : > { %1375 = vmatprep.subr.mxu1 %v1597_v3  ;;  %1300 = vmatprep.subr.mxu0 %v991_v52 }
 0x44c   : > { %1376 = vmatpush1.msra.mxu1 %v1237_v53  ;;  %1301 = vmatpush1.msra.mxu0 %v990_v51 }
 0x44d   : > { %v945_v54 = vpop.permute.xlu1 %944  ;;  %1377 = vmatprep.subr.mxu1 %v1597_v3  ;;  %v906_v55 = vpop.permute.xlu0 %905  ;;  %v1234_v56 = vld [vmem:[#allocation3 + $0xb8] sm:$0xff]  ;;  %1302 = vmatprep.subr.mxu0 %v1927_v9 }
 0x44e   : > { %v950_v57 = vsel %vm744_vm4, %v1914_v1, %v945_v54  ;;  %v951_v58 = vsel %vm744_vm4, %v945_v54, %v947_v49  ;;  %923 = vst.msk [vmem:[#allocation3 + $0x58] sm:$0xff] %vm257_vm0, %v906_v55  ;;  %1378 = vmatpush1.msra.mxu1 %v1234_v56  ;;  %1303 = vmatpush1.msra.mxu0 %v1924_v8  ;;  %v1225_v1 = vld [vmem:[#allocation3 + $0x70] sm:$0xff]  ;;  %v1219_v8 = vld [vmem:[#allocation3 + $0x40] sm:$0xff] }
 0x44f   : > { %1379 = vmatprep.subr.mxu1 %v1597_v3  ;;  %1304 = vmatprep.subr.mxu0 %v951_v58 }
 0x450   : > { %1380 = vmatpush1.msra.mxu1 %v1231_v59  ;;  %1305 = vmatpush1.msra.mxu0 %v950_v57 }
 0x451   : > { %v904_v60 = vpop.permute.xlu1 %903  ;;  %1381 = vmatprep.subr.mxu1 %v1597_v3  ;;  %v866_v61 = vpop.permute.xlu0 %865  ;;  %v1228_v62 = vld [vmem:[#allocation3 + $0x88] sm:$0xff]  ;;  %1306 = vmatprep.subr.mxu0 %v1935_v13 }
 0x452   : > { %v910_v63 = vsel %vm907_vm7, %v1929_v10, %v904_v60  ;;  %v911_v0 = vsel %vm907_vm7, %v904_v60, %v906_v55  ;;  %882 = vst.msk [vmem:[#allocation3 + $0x28] sm:$0xff] %vm257_vm0, %v866_v61  ;;  %1382 = vmatpush1.msra.mxu1 %v1228_v62  ;;  %1307 = vmatpush1.msra.mxu0 %v1932_v12 }
 0x453   : > { %1383 = vmatprep.subr.mxu1 %v1597_v3  ;;  %1308 = vmatprep.subr.mxu0 %v911_v0 }
 0x454   : > { %1384 = vmatpush1.msra.mxu1 %v1225_v1  ;;  %1309 = vmatpush1.msra.mxu0 %v910_v63 }
 0x455   : > { %v864_v2 = vpop.permute.xlu1 %863  ;;  %1385 = vmatprep.subr.mxu1 %v1597_v3  ;;  %v1189_v5 = vpop.permute.xlu0 %1188  ;;  %v1222_v4 = vld [vmem:[#allocation3 + $0x58] sm:$0xff]  ;;  %1310 = vmatprep.subr.mxu0 %v1942_v17 }
 0x456   : > { %v869_v6 = vsel %vm292_vm8, %v1944_v18, %v864_v2  ;;  %v870_v7 = vsel %vm292_vm8, %v864_v2, %v866_v61  ;;  %1206 = vst.msk [vmem:[#allocation3 + $0x1a8] sm:$0xff] %vm257_vm0, %v1189_v5  ;;  %1386 = vmatpush1.msra.mxu1 %v1222_v4  ;;  %1311 = vmatpush1.msra.mxu0 %v1939_v16 }
 0x457   : > { %1387 = vmatprep.subr.mxu1 %v1597_v3  ;;  %1312 = vmatprep.subr.mxu0 %v870_v7 }
 0x458   : > { %1388 = vmatpush1.msra.mxu1 %v1219_v8  ;;  %1313 = vmatpush1.msra.mxu0 %v869_v6 }
 0x459   : > { %v1187_v9 = vpop.permute.xlu1 %1186  ;;  %1389 = vmatprep.subr.mxu1 %v1597_v3  ;;  %v1179_v10 = vpop.permute.xlu0 %1178  ;;  %v1216_v11 = vld [vmem:[#allocation3 + $0x28] sm:$0xff]  ;;  %1314 = vmatprep.subr.mxu0 %v1952_v23 }
 0x45a   : > { %v1193_v12 = vsel %vm1190_vm1, %v1955_v24, %v1187_v9  ;;  %v1194_v13 = vsel %vm1190_vm1, %v1187_v9, %v1189_v5  ;;  %v1191_v14 = vsel %vm1190_vm1, %v1179_v10, %v1949_v22  ;;  %1390 = vmatpush1.msra.mxu1 %v1216_v11  ;;  %1315 = vmatpush1.msra.mxu0 %v1947_v20  ;;  %v1210_v20 = vld [vmem:[%s2051_s3 + $0x18] sm:$0xff] }
 0x45b   : > { %1391 = vmatprep.subr.mxu1 %v1597_v3  ;;  %1344 = vmatprep.subr.mxu0 %v1194_v13 }
 0x45c   : > { %1392 = vmatpush1.msra.mxu1 %v1213_v15  ;;  %1345 = vmatpush2.msra.mxu0 %v1193_v12 }
 0x45d   : > { %v1183_v16 = vpop.permute.xlu1 %1182  ;;  %1421 = vmatprep.subr.mxu1 %v1597_v3  ;;  %v1264_v17 = vld [vmem:[#allocation3 + $0x1a8] sm:$0xff] }
 0x45e   : > { %v1192_v18 = vsel %vm1190_vm1, %v1949_v22, %v1183_v16  ;;  %1203 = vst.msk [vmem:[#allocation3 + $0x190] sm:$0xff] %vm257_vm0, %v1183_v16  ;;  %1422 = vmatpush2.msra.mxu1 %v1264_v17 }
 0x45f   : > { %1423 = vmatprep.subr.mxu1 %v1597_v3  ;;  %1346 = vmatprep.subr.mxu0 %v1192_v18 }
 0x460   : > { %1347 = vmatpush2.msra.mxu0 %v1191_v14 }
 0x461   : > { %1349 = vmatmul.mubr.f32.vlgmr.msra.gmra.mxu0 %v1207_v19 }
 0x462   : > { %1515 = vmatprep.mubr.msk.f32.mxu0 %vm1277_vm2, %v1210_v20 }
 0x465   : > { %v1261_v22 = vld [vmem:[#allocation3 + $0x190] sm:$0xff]  ;;  %1355 = vmatmul.mubr.f32.gmra.mxu0 %v1209_v21 }
 0x466   : > { %1424 = vmatpush2.msra.mxu1 %v1261_v22  ;;  %v1275_v28 = vpop.permute.xlu0 %1274 }
 0x467   : > { %1426 = vmatmul.mubr.f32.vlgmr.msra.gmra.mxu1 %v1207_v19 }
 0x468   : > { %1517 = vmatprep.mubr.msk.f32.mxu1 %vm1277_vm2, %v1210_v20 }
 0x46a   : > { %v1270_v3 = vpop.permute.xlu1 %1269 }
 0x46b   : > { %1431 = vmatmul.mubr.f32.gmra.mxu1 %v1209_v21 }
 0x521   : > { %v1350_v23 = vpop.f32.mrf.mxu0 }
 0x522   : > { %v1351_v24 = vadd.f32 %v1350_v23, %v1270_v3 }
 0x523   : > { %v1352_v25 = vpop.f32.mrf.mxu0 }
 0x524   : > { %v1436_v26 = vmax.f32 %v1351_v24, 0.0  ;;  %v1353_v27 = vadd.f32 %v1352_v25, %v1270_v3 }
 0x525   : > { %v1356_v29 = vpop.f32.mrf.mxu0 }
 0x526   : > { %1442 = vst [vmem:[%s251_s25] sm:$0xff] %v1436_v26  ;;  %v1437_v30 = vmax.f32 %v1353_v27, 0.0  ;;  %v1357_v31 = vadd.f32 %v1356_v29, %v1275_v28 }
 0x527   : > { %v1427_v32 = vpop.f32.mrf.mxu1  ;;  %v1358_v33 = vpop.f32.mrf.mxu0 }
 0x528   : > { %v1428_v34 = vadd.f32 %v1427_v32, %v1270_v3  ;;  %1443 = vst [vmem:[%s251_s25 + $0x8] sm:$0xff] %v1437_v30  ;;  %v1439_v35 = vmax.f32 %v1357_v31, 0.0  ;;  %v1359_v36 = vadd.f32 %v1358_v33, %v1275_v28 }
 0x529   : > { %v1429_v37 = vpop.f32.mrf.mxu1 }
 0x52a   : > { %v1438_v38 = vmax.f32 %v1428_v34, 0.0  ;;  %1445 = vst [vmem:[%s251_s25 + $0x18] sm:$0xff] %v1439_v35  ;;  %v1440_v39 = vmax.f32 %v1359_v36, 0.0 }
 0x52b   : > { %v1432_v40 = vpop.f32.mrf.mxu1 }
 0x52c   : > { %1444 = vst.msk [vmem:[%s251_s25 + $0x10] sm:$0xff] %vm257_vm0, %v1438_v38  ;;  %v1433_v41 = vadd.f32 %v1432_v40, %v1275_v28  ;;  %1446 = vst [vmem:[%s251_s25 + $0x20] sm:$0xff] %v1440_v39 }
 0x52d   : > { %v1434_v42 = vpop.f32.mrf.mxu1 }
 0x52e   : > { %v1441_v43 = vmax.f32 %v1433_v41, 0.0 }
 0x530   : > { %1447 = vst.msk [vmem:[%s251_s25 + $0x28] sm:$0xff] %vm257_vm0, %v1441_v43 }
 0x531 PF: > { %s16_s21 = sadd.s32 1, %s1589_s21  }
 0x532   : > { %p13_p4 = scmp.ge.s32.totalorder %s16_s21, 4  }
 0x534   :  { %15 = sbr.rel (!%p13_p4) target bundleno = 1 (0x1), region = 74 }

</bundles_post_ra>
